<compile_context>
chip_gen: v6e
topology: v6e:2x2x1
jax: 0.10.0
libtpu: 0.0.40
codegen_flags: <defaults>
</compile_context>

<pallas_src>
import jax
import jax.numpy as jnp
from jax.experimental import pallas as pl
from jax.experimental.pallas import tpu as pltpu


# ---------------------------------------------------------------------------
# Kernel
# ---------------------------------------------------------------------------
def _suffix_kernel(x_ref,
                   w0_ref, b0_ref,
                   w1_ref, b1_ref,
                   w2_ref, b2_ref,
                   w3_ref, b3_ref,
                   o_ref):
    """Fused 4-layer MLP on one (TB, F_pad) batch tile.

    Weights are (in, out) already; biases are (1, out) f32.  All matmuls
    accumulate in f32; activations are re-cast to the weight dtype between
    layers so bf16 weights hit the bf16 MXU path.
    """
    cdt = w0_ref.dtype  # compute dtype for MXU inputs (f32 or bf16)

    h = jnp.dot(x_ref[...], w0_ref[...],
                preferred_element_type=jnp.float32) + b0_ref[...]
    h = jnp.maximum(h, 0.0)                                   # relu(model(x))

    h = jnp.dot(h.astype(cdt), w1_ref[...],
                preferred_element_type=jnp.float32) + b1_ref[...]
    h = jnp.maximum(h, 0.0)                                   # relu(ln(xe))

    h = jnp.dot(h.astype(cdt), w2_ref[...],
                preferred_element_type=jnp.float32) + b2_ref[...]
    h = jnp.maximum(h, 0.0)                                   # relu(ln2(xe))

    h = jnp.dot(h.astype(cdt), w3_ref[...],
                preferred_element_type=jnp.float32) + b3_ref[...]
    o_ref[...] = h.astype(o_ref.dtype)                        # ln3(xe)


# ---------------------------------------------------------------------------
# Param preparation (done once, outside the forward path)
# ---------------------------------------------------------------------------
def _round_up(n, m):
    return ((n + m - 1) // m) * m


def _pad2d(a, rows, cols):
    return jnp.pad(a, ((0, rows - a.shape[0]), (0, cols - a.shape[1])))


def prepare_params(params, compute_dtype=jnp.float32):
    """Transpose PyTorch (out,in) weights to (in,out), zero-pad all feature
    dims to multiples of 128, cast weights to `compute_dtype` once."""
    f_in = params["w0"].shape[1]
    d = params["w0"].shape[0]
    c = params["w3"].shape[0]
    f_pad = _round_up(f_in, 128)
    d_pad = _round_up(d, 128)
    c_pad = _round_up(c, 128)

    def wt(w, rows, cols):
        return _pad2d(jnp.asarray(w, jnp.float32).T, rows, cols).astype(compute_dtype)

    def bias(b, cols):
        b = jnp.asarray(b, jnp.float32).reshape(1, -1)
        return _pad2d(b, 1, cols)  # biases stay f32 (added post-accumulate)

    return dict(
        w0=wt(params["w0"], f_pad, d_pad), b0=bias(params["b0"], d_pad),
        w1=wt(params["w1"], d_pad, d_pad), b1=bias(params["b1"], d_pad),
        w2=wt(params["w2"], d_pad, d_pad), b2=bias(params["b2"], d_pad),
        w3=wt(params["w3"], d_pad, c_pad), b3=bias(params["b3"], c_pad),
        dims=(f_in, d, c, f_pad, d_pad, c_pad),
        compute_dtype=compute_dtype,
    )


# ---------------------------------------------------------------------------
# Forward wrapper
# ---------------------------------------------------------------------------
def model_sufix_forward(x, prepped, *, block_b=512):
    """x: (B, F_IN) float32.  prepped: output of prepare_params."""
    f_in, d, c, f_pad, d_pad, c_pad = prepped["dims"]
    cdt = prepped["compute_dtype"]

    B = x.shape[0]
    # Batch tile: multiple of 8 (sublane), as large as reasonable (bigger
    # tiles amortize the ~0.35 us per-grid-step overhead) but no bigger than
    # the (padded) batch itself.
    tb = min(block_b, _round_up(B, 8))
    b_pad = _round_up(B, tb)
    nb = b_pad // tb

    # Pad x once: rows to b_pad, features to f_pad (zero padding is inert
    # through the matmuls; padded rows are discarded by the final slice).
    x_p = jnp.pad(x.astype(jnp.float32),
                  ((0, b_pad - B), (0, f_pad - f_in))).astype(cdt)

    weights = (prepped["w0"], prepped["b0"],
               prepped["w1"], prepped["b1"],
               prepped["w2"], prepped["b2"],
               prepped["w3"], prepped["b3"])

    def resident(a):  # full array, same block index every batch step -> 1 DMA
        return pl.BlockSpec(a.shape, lambda i: (0, 0))

    in_specs = [pl.BlockSpec((tb, f_pad), lambda i: (i, 0))]
    in_specs += [resident(a) for a in weights]
    out_spec = pl.BlockSpec((tb, c_pad), lambda i: (i, 0))

    # VMEM budget: resident weights/biases + double-buffered x/out tiles
    # + f32 intermediates, with 2x margin; keep below v7x's 64 MiB physical.
    def nbytes(a):
        return a.size * a.dtype.itemsize

    needed = (sum(nbytes(a) for a in weights)
              + 2 * tb * f_pad * jnp.dtype(cdt).itemsize   # x double buffer
              + 2 * tb * c_pad * 4                         # out double buffer
              + 4 * tb * d_pad * 4)                        # f32 intermediates
    vmem_limit = int(min(max(2 * needed, 32 * 2 ** 20), 56 * 2 ** 20))

    out_p = pl.pallas_call(
        _suffix_kernel,
        out_shape=jax.ShapeDtypeStruct((b_pad, c_pad), jnp.float32),
        grid_spec=pltpu.PrefetchScalarGridSpec(
            num_scalar_prefetch=0,
            grid=(nb,),
            in_specs=in_specs,
            out_specs=out_spec,
        ),
        compiler_params=pltpu.CompilerParams(
            dimension_semantics=("parallel",),
            vmem_limit_bytes=vmem_limit,
        ),
    )(x_p, *weights)

    return out_p[:B, :c]


# ---------------------------------------------------------------------------
# Init + reference
# ---------------------------------------------------------------------------
def init_params(key, f_in, d, num_classes):
    """Deterministic PyTorch-style Linear init (uniform +/- 1/sqrt(fan_in))."""
    ks = jax.random.split(key, 8)

    def lin(kw, kb, fan_in, fan_out):
        bound = 1.0 / jnp.sqrt(fan_in)
        w = jax.random.uniform(kw, (fan_out, fan_in), jnp.float32, -bound, bound)
        b = jax.random.uniform(kb, (fan_out,), jnp.float32, -bound, bound)
        return w, b

    w0, b0 = lin(ks[0], ks[1], f_in, d)            # inner model objective layer
    w1, b1 = lin(ks[2], ks[3], d, d)               # self.ln
    w2, b2 = lin(ks[4], ks[5], d, d)               # self.ln2
    w3, b3 = lin(ks[6], ks[7], d, num_classes)     # self.ln3
    return dict(w0=w0, b0=b0, w1=w1, b1=b1, w2=w2, b2=b2, w3=w3, b3=b3)


def _reference(x, p):
    h = jnp.maximum(x @ p["w0"].T + p["b0"], 0.0)
    h = jnp.maximum(h @ p["w1"].T + p["b1"], 0.0)
    h = jnp.maximum(h @ p["w2"].T + p["b2"], 0.0)
    return h @ p["w3"].T + p["b3"]


if __name__ == "__main__":
    B, F_IN, D, NUM_CLASSES = 16, 32, 32, 16

    key = jax.random.PRNGKey(0)
    kx, kp = jax.random.split(key)
    x = jax.random.normal(kx, (B, F_IN), jnp.float32)
    params = init_params(kp, F_IN, D, NUM_CLASSES)
    ref = _reference(x, params)

    # Exact-semantics f32 path.
    prepped_f32 = prepare_params(params, compute_dtype=jnp.float32)
    out = jax.block_until_ready(model_sufix_forward(x, prepped_f32))
    assert out.shape == (B, NUM_CLASSES)
    assert jnp.allclose(out, ref, atol=1e-4, rtol=1e-4), "f32 mismatch vs reference"

    # bf16-weight MXU path (f32 accumulate) — looser tolerance for bf16 rounding.
    prepped_bf16 = prepare_params(params, compute_dtype=jnp.bfloat16)
    out_bf16 = jax.block_until_ready(model_sufix_forward(x, prepped_bf16))
    assert jnp.allclose(out_bf16, ref, atol=5e-2, rtol=5e-2), "bf16 mismatch vs reference"

    print("KERNEL_OK")
</pallas_src>

<mosaic_0001>
module attributes {stable_mosaic.version = 11 : i64} {
  func.func @_suffix_kernel(%arg0: i32, %arg1: memref<16x128xf32, #tpu.memory_space<vmem>>, %arg2: memref<128x128xf32, #tpu.memory_space<vmem>>, %arg3: memref<1x128xf32, #tpu.memory_space<vmem>>, %arg4: memref<128x128xf32, #tpu.memory_space<vmem>>, %arg5: memref<1x128xf32, #tpu.memory_space<vmem>>, %arg6: memref<128x128xf32, #tpu.memory_space<vmem>>, %arg7: memref<1x128xf32, #tpu.memory_space<vmem>>, %arg8: memref<128x128xf32, #tpu.memory_space<vmem>>, %arg9: memref<1x128xf32, #tpu.memory_space<vmem>>, %arg10: memref<16x128xf32, #tpu.memory_space<vmem>>) attributes {dimension_semantics = [#tpu.dimension_semantics<parallel>], iteration_bounds = array<i64: 1>, scalar_prefetch = 0 : i64, scratch_operands = 0 : i64, tpu.core_type = #tpu.core_type<tc>, window_params = [{transform_indices = @transform_0, window_bounds = array<i64: 16, 128>}, {pipeline_mode = #tpu.pipeline_mode<synchronous>, transform_indices = @transform_1, window_bounds = array<i64: 128, 128>}, {pipeline_mode = #tpu.pipeline_mode<synchronous>, transform_indices = @transform_2, window_bounds = array<i64: 1, 128>}, {pipeline_mode = #tpu.pipeline_mode<synchronous>, transform_indices = @transform_3, window_bounds = array<i64: 128, 128>}, {pipeline_mode = #tpu.pipeline_mode<synchronous>, transform_indices = @transform_4, window_bounds = array<i64: 1, 128>}, {pipeline_mode = #tpu.pipeline_mode<synchronous>, transform_indices = @transform_5, window_bounds = array<i64: 128, 128>}, {pipeline_mode = #tpu.pipeline_mode<synchronous>, transform_indices = @transform_6, window_bounds = array<i64: 1, 128>}, {pipeline_mode = #tpu.pipeline_mode<synchronous>, transform_indices = @transform_7, window_bounds = array<i64: 128, 128>}, {pipeline_mode = #tpu.pipeline_mode<synchronous>, transform_indices = @transform_8, window_bounds = array<i64: 1, 128>}, {transform_indices = @transform_9, window_bounds = array<i64: 16, 128>}]} {
    %c0 = arith.constant 0 : index
    %c0_0 = arith.constant 0 : index
    %0 = vector.load %arg1[%c0, %c0_0] : memref<16x128xf32, #tpu.memory_space<vmem>>, vector<16x128xf32>
    %c0_1 = arith.constant 0 : index
    %c0_2 = arith.constant 0 : index
    %1 = vector.load %arg2[%c0_1, %c0_2] : memref<128x128xf32, #tpu.memory_space<vmem>>, vector<128x128xf32>
    %cst = arith.constant dense<0.000000e+00> : vector<16x128xf32>
    %2 = tpu.matmul %0, %1, %cst {dimension_numbers = #tpu.dot_dimension_numbers<[1], [0], [0], [1], [0, 0, 1, 1], [], []>} : vector<16x128xf32>, vector<128x128xf32>, vector<16x128xf32> -> vector<16x128xf32>
    %c0_3 = arith.constant 0 : index
    %c0_4 = arith.constant 0 : index
    %3 = vector.load %arg3[%c0_3, %c0_4] : memref<1x128xf32, #tpu.memory_space<vmem>>, vector<1x128xf32>
    %4 = vector.broadcast %3 : vector<1x128xf32> to vector<16x128xf32>
    %5 = arith.addf %2, %4 : vector<16x128xf32>
    %cst_5 = arith.constant 0.000000e+00 : f32
    %6 = vector.broadcast %cst_5 : f32 to vector<16x128xf32>
    %7 = arith.maximumf %5, %6 : vector<16x128xf32>
    %c0_6 = arith.constant 0 : index
    %c0_7 = arith.constant 0 : index
    %8 = vector.load %arg4[%c0_6, %c0_7] : memref<128x128xf32, #tpu.memory_space<vmem>>, vector<128x128xf32>
    %cst_8 = arith.constant dense<0.000000e+00> : vector<16x128xf32>
    %9 = tpu.matmul %7, %8, %cst_8 {dimension_numbers = #tpu.dot_dimension_numbers<[1], [0], [0], [1], [0, 0, 1, 1], [], []>} : vector<16x128xf32>, vector<128x128xf32>, vector<16x128xf32> -> vector<16x128xf32>
    %c0_9 = arith.constant 0 : index
    %c0_10 = arith.constant 0 : index
    %10 = vector.load %arg5[%c0_9, %c0_10] : memref<1x128xf32, #tpu.memory_space<vmem>>, vector<1x128xf32>
    %11 = vector.broadcast %10 : vector<1x128xf32> to vector<16x128xf32>
    %12 = arith.addf %9, %11 : vector<16x128xf32>
    %cst_11 = arith.constant 0.000000e+00 : f32
    %13 = vector.broadcast %cst_11 : f32 to vector<16x128xf32>
    %14 = arith.maximumf %12, %13 : vector<16x128xf32>
    %c0_12 = arith.constant 0 : index
    %c0_13 = arith.constant 0 : index
    %15 = vector.load %arg6[%c0_12, %c0_13] : memref<128x128xf32, #tpu.memory_space<vmem>>, vector<128x128xf32>
    %cst_14 = arith.constant dense<0.000000e+00> : vector<16x128xf32>
    %16 = tpu.matmul %14, %15, %cst_14 {dimension_numbers = #tpu.dot_dimension_numbers<[1], [0], [0], [1], [0, 0, 1, 1], [], []>} : vector<16x128xf32>, vector<128x128xf32>, vector<16x128xf32> -> vector<16x128xf32>
    %c0_15 = arith.constant 0 : index
    %c0_16 = arith.constant 0 : index
    %17 = vector.load %arg7[%c0_15, %c0_16] : memref<1x128xf32, #tpu.memory_space<vmem>>, vector<1x128xf32>
    %18 = vector.broadcast %17 : vector<1x128xf32> to vector<16x128xf32>
    %19 = arith.addf %16, %18 : vector<16x128xf32>
    %cst_17 = arith.constant 0.000000e+00 : f32
    %20 = vector.broadcast %cst_17 : f32 to vector<16x128xf32>
    %21 = arith.maximumf %19, %20 : vector<16x128xf32>
    %c0_18 = arith.constant 0 : index
    %c0_19 = arith.constant 0 : index
    %22 = vector.load %arg8[%c0_18, %c0_19] : memref<128x128xf32, #tpu.memory_space<vmem>>, vector<128x128xf32>
    %cst_20 = arith.constant dense<0.000000e+00> : vector<16x128xf32>
    %23 = tpu.matmul %21, %22, %cst_20 {dimension_numbers = #tpu.dot_dimension_numbers<[1], [0], [0], [1], [0, 0, 1, 1], [], []>} : vector<16x128xf32>, vector<128x128xf32>, vector<16x128xf32> -> vector<16x128xf32>
    %c0_21 = arith.constant 0 : index
    %c0_22 = arith.constant 0 : index
    %24 = vector.load %arg9[%c0_21, %c0_22] : memref<1x128xf32, #tpu.memory_space<vmem>>, vector<1x128xf32>
    %25 = vector.broadcast %24 : vector<1x128xf32> to vector<16x128xf32>
    %26 = arith.addf %23, %25 : vector<16x128xf32>
    %c0_23 = arith.constant 0 : index
    %c0_24 = arith.constant 0 : index
    %27 = vector.load %arg10[%c0_23, %c0_24] : memref<16x128xf32, #tpu.memory_space<vmem>>, vector<16x128xf32>
    tpu.vector_store %arg10[%c0_23, %c0_24], %26 {strides = array<i32>} : memref<16x128xf32, #tpu.memory_space<vmem>>, vector<16x128xf32>,
    return
  }
  func.func @transform_0(%arg0: i32) -> (i32, i32) {
    %c0_i32 = arith.constant 0 : i32
    %c0_i32_0 = arith.constant 0 : i32
    return %arg0, %c0_i32 : i32, i32
  }
  func.func @transform_1(%arg0: i32) -> (i32, i32) {
    %c0_i32 = arith.constant 0 : i32
    %c0_i32_0 = arith.constant 0 : i32
    %c0_i32_1 = arith.constant 0 : i32
    return %c0_i32, %c0_i32_0 : i32, i32
  }
  func.func @transform_2(%arg0: i32) -> (i32, i32) {
    %c0_i32 = arith.constant 0 : i32
    %c0_i32_0 = arith.constant 0 : i32
    %c0_i32_1 = arith.constant 0 : i32
    return %c0_i32, %c0_i32_0 : i32, i32
  }
  func.func @transform_3(%arg0: i32) -> (i32, i32) {
    %c0_i32 = arith.constant 0 : i32
    %c0_i32_0 = arith.constant 0 : i32
    %c0_i32_1 = arith.constant 0 : i32
    return %c0_i32, %c0_i32_0 : i32, i32
  }
  func.func @transform_4(%arg0: i32) -> (i32, i32) {
    %c0_i32 = arith.constant 0 : i32
    %c0_i32_0 = arith.constant 0 : i32
    %c0_i32_1 = arith.constant 0 : i32
    return %c0_i32, %c0_i32_0 : i32, i32
  }
  func.func @transform_5(%arg0: i32) -> (i32, i32) {
    %c0_i32 = arith.constant 0 : i32
    %c0_i32_0 = arith.constant 0 : i32
    %c0_i32_1 = arith.constant 0 : i32
    return %c0_i32, %c0_i32_0 : i32, i32
  }
  func.func @transform_6(%arg0: i32) -> (i32, i32) {
    %c0_i32 = arith.constant 0 : i32
    %c0_i32_0 = arith.constant 0 : i32
    %c0_i32_1 = arith.constant 0 : i32
    return %c0_i32, %c0_i32_0 : i32, i32
  }
  func.func @transform_7(%arg0: i32) -> (i32, i32) {
    %c0_i32 = arith.constant 0 : i32
    %c0_i32_0 = arith.constant 0 : i32
    %c0_i32_1 = arith.constant 0 : i32
    return %c0_i32, %c0_i32_0 : i32, i32
  }
  func.func @transform_8(%arg0: i32) -> (i32, i32) {
    %c0_i32 = arith.constant 0 : i32
    %c0_i32_0 = arith.constant 0 : i32
    %c0_i32_1 = arith.constant 0 : i32
    return %c0_i32, %c0_i32_0 : i32, i32
  }
  func.func @transform_9(%arg0: i32) -> (i32, i32) {
    %c0_i32 = arith.constant 0 : i32
    %c0_i32_0 = arith.constant 0 : i32
    return %arg0, %c0_i32 : i32, i32
  }
}

</mosaic_0001>

<bundles_post_ra>
// kernel: tpu_custom_call.1
= control target key start
LH: loop header
LB: loop body
LE: loop exit
PB: predicated region body
PF: predicated region fallthrough
CT: control target
= control target key end

     0   :  { %14 = vsyncpa [#allocation3], 0  ;;  %s980_s0 = inlined_call_operand.hbm [shape: f32[16,128], index: 0, kind: input, shape index: {}]   ;;  %s981_s1 = inlined_call_operand.hbm [shape: f32[128,128], index: 1, kind: input, shape index: {}]   ;;  %s982_s2 = inlined_call_operand.vmem [shape: f32[1,128], index: 2, kind: input, shape index: {}]   ;;  %s983_s3 = inlined_call_operand.hbm [shape: f32[128,128], index: 3, kind: input, shape index: {}]   ;;  %s984_s4 = inlined_call_operand.vmem [shape: f32[1,128], index: 4, kind: input, shape index: {}]   ;;  %s985_s5 = inlined_call_operand.hbm [shape: f32[128,128], index: 5, kind: input, shape index: {}]   ;;  %s986_s6 = inlined_call_operand.vmem [shape: f32[1,128], index: 6, kind: input, shape index: {}]   ;;  %s987_s7 = inlined_call_operand.hbm [shape: f32[128,128], index: 7, kind: input, shape index: {}]   ;;  %s988_s8 = inlined_call_operand.vmem [shape: f32[1,128], index: 8, kind: input, shape index: {}]   ;;  %s989_s9 = inlined_call_operand.hbm [shape: f32[16,128], index: 9, kind: output, shape index: {}]  }
   0x1   :  { %15 = vsyncpa [#allocation6], 0 }
   0x2   :  { %16 = vsyncpa [#allocation9], 0 }
   0x3   :  { %17 = vsyncpa [#allocation4], 0  ;;  %s874_s30 = smov [#allocation5]   ;;  %s875_s11 = smov [#allocation8]  }
   0x4   :  { %s35_s10 = sshll.u32 %s874_s30, 4  ;;  %s63_s12 = sshll.u32 %s875_s11, 4  ;;  %s36_s10 = int_to_ptr.vmem [resolvable:$true] %s35_s10  ;;  %s64_s12 = int_to_ptr.vmem [resolvable:$true] %s63_s12 }
   0x5   :  { %s754_s13 = scalar_lea.vmem %s36_s10, 2048  ;;  %p759_p1 = scmp.lt.s32.totalorder %s36_s10, %s36_s10 }
   0x6   :  { %p755_p0 = scmp.ne.s32.totalorder %s36_s10, %s754_s13  ;;  %p760_p2 = scmp.lt.s32.totalorder %s754_s13, %s754_s13 }
   0x8   :  { %p761_p3 = por %p760_p2, %p759_p1 }
   0xa   :  { %p762_p4 = pnand %p761_p3, %p755_p0 }
   0xc   :  { %765 = shalt.err (!%p762_p4)
}
   0xd   :  { %s876_s14 = smov 128   ;;  %s877_s15 = smov 8  }
   0xe   :  { %41 = dma.hbm_to_vmem [thread:$0]  %s981_s1, 2048, %s36_s10, [#allocation6], %s876_s14, %s876_s14, %s877_s15  }
   0xf   :  { %s774_s18 = scalar_lea.vmem %s64_s12, 2048  ;;  %p779_p6 = scmp.lt.s32.totalorder %s64_s12, %s64_s12 }
  0x10   :  { %p775_p5 = scmp.ne.s32.totalorder %s64_s12, %s774_s18  ;;  %p780_p7 = scmp.lt.s32.totalorder %s774_s18, %s774_s18 }
  0x12   :  { %p781_p8 = por %p780_p7, %p779_p6 }
  0x14   :  { %p782_p9 = pnand %p781_p8, %p775_p5 }
  0x16   :  { %785 = shalt.err (!%p782_p9)
}
  0x17   :  { %69 = dma.hbm_to_vmem [thread:$0]  %s985_s5, 2048, %s64_s12, [#allocation9], %s876_s14, %s876_s14, %s877_s15  }
  0x18   :  { %s878_s21 = smov [#allocation2]   ;;  %s879_s23 = smov [#allocation7]  }
  0x19   :  { %s23_s22 = sshll.u32 %s878_s21, 4  ;;  %s49_s24 = sshll.u32 %s879_s23, 4  ;;  %s24_s22 = int_to_ptr.vmem [resolvable:$true] %s23_s22  ;;  %s50_s24 = int_to_ptr.vmem [resolvable:$true] %s49_s24 }
  0x1a   :  { %s794_s1 = scalar_lea.vmem %s24_s22, 256  ;;  %p799_p11 = scmp.lt.s32.totalorder %s24_s22, %s24_s22 }
  0x1b   :  { %p795_p10 = scmp.ne.s32.totalorder %s24_s22, %s794_s1  ;;  %p800_p12 = scmp.lt.s32.totalorder %s794_s1, %s794_s1 }
  0x1d   :  { %p801_p13 = por %p800_p12, %p799_p11 }
  0x1f   :  { %p802_p0 = pnand %p801_p13, %p795_p10 }
  0x21   :  { %805 = shalt.err (!%p802_p0)
}
  0x22   :  { %29 = dma.hbm_to_vmem [thread:$0]  %s980_s0, 256, %s24_s22, [#allocation3], %s876_s14, %s876_s14, %s877_s15  }
  0x23   :  { %s814_s5 = scalar_lea.vmem %s50_s24, 2048  ;;  %p819_p2 = scmp.lt.s32.totalorder %s50_s24, %s50_s24 }
  0x24   :  { %p815_p1 = scmp.ne.s32.totalorder %s50_s24, %s814_s5  ;;  %p820_p3 = scmp.lt.s32.totalorder %s814_s5, %s814_s5 }
  0x26   :  { %p821_p4 = por %p820_p3, %p819_p2 }
  0x28   :  { %p822_p5 = pnand %p821_p4, %p815_p1 }
  0x2a   :  { %825 = shalt.err (!%p822_p5)
}
  0x2b   :  { %55 = dma.hbm_to_vmem [thread:$0]  %s983_s3, 2048, %s50_s24, [#allocation6], %s876_s14, %s876_s14, %s877_s15  }
  0x2c   :  { %s880_s29 = smov [#allocation10]  }
  0x2d   :  { %s77_s30 = sshll.u32 %s880_s29, 4  ;;  %s78_s30 = int_to_ptr.vmem [resolvable:$true] %s77_s30 }
  0x2e   :  { %s834_s10 = scalar_lea.vmem %s78_s30, 2048  ;;  %p839_p7 = scmp.lt.s32.totalorder %s78_s30, %s78_s30 }
  0x2f   :  { %p835_p6 = scmp.ne.s32.totalorder %s78_s30, %s834_s10  ;;  %p840_p8 = scmp.lt.s32.totalorder %s834_s10, %s834_s10 }
  0x31   :  { %p841_p9 = por %p840_p8, %p839_p7 }
  0x33   :  { %p842_p10 = pnand %p841_p9, %p835_p6 }
  0x35   :  { %845 = shalt.err (!%p842_p10)
}
  0x36   :  { %83 = dma.hbm_to_vmem [thread:$0]  %s987_s7, 2048, %s78_s30, [#allocation9], %s876_s14, %s876_s14, %s877_s15  }
  0x37   :  { %866 = dma.done.wait [#allocation3], 256  }
  0x38   :  { %867 = vsyncadd [#allocation3], 4294967040 }
  0x39   :  { %868 = dma.done.wait [#allocation6], 4096  }
  0x3a   :  { %869 = vsyncadd [#allocation6], 4294963200 }
  0x3b   :  { %870 = dma.done.wait [#allocation9], 4096  }
  0x3c   :  { %871 = vsyncadd [#allocation9], 4294963200  ;;  %v118_v0 = vld [vmem:[#allocation5 + $0x78] sm:$0xff]  ;;  %v117_v1 = vld [vmem:[#allocation5 + $0x70] sm:$0xff]  ;;  %s881_s18 = smov [#allocation11]  }
  0x3d   :  { %598 = vmatprep.subr.mxu0 %v118_v0  ;;  %v116_v2 = vld [vmem:[#allocation5 + $0x68] sm:$0xff]  ;;  %v115_v3 = vld [vmem:[#allocation5 + $0x60] sm:$0xff]  ;;  %v101_v4 = vld [vmem:[#allocation2] sm:$0xff]  ;;  %s508_s19 = sshll.u32 %s881_s18, 4  ;;  %s509_s19 = int_to_ptr.vmem [resolvable:$true] %s508_s19 }
  0x3e   :  { %599 = vmatpush3.msra.mxu0 %v118_v0  ;;  %v114_v5 = vld [vmem:[#allocation5 + $0x58] sm:$0xff]  ;;  %630 = vmatprep.mubr.f32.mxu0 %v101_v4  ;;  %v217_v7 = vld [vmem:[#allocation7 + $0x70] sm:$0xff]  ;;  %v216_v9 = vld [vmem:[#allocation7 + $0x68] sm:$0xff]  ;;  %p851_p12 = scmp.lt.s32.totalorder %s509_s19, %s509_s19 }
  0x3f   :  { %600 = vmatprep.subr.mxu0 %v117_v1  ;;  %v218_v6 = vld [vmem:[#allocation7 + $0x78] sm:$0xff]  ;;  %v113_v8 = vld [vmem:[#allocation5 + $0x50] sm:$0xff]  ;;  %v112_v10 = vld [vmem:[#allocation5 + $0x48] sm:$0xff] }
  0x40   :  { %601 = vmatpush3.msra.mxu0 %v117_v1  ;;  %633 = vmatprep.subr.mxu1 %v218_v6  ;;  %v215_v11 = vld [vmem:[#allocation7 + $0x60] sm:$0xff]  ;;  %v214_v13 = vld [vmem:[#allocation7 + $0x58] sm:$0xff]  ;;  %v213_v15 = vld [vmem:[#allocation7 + $0x50] sm:$0xff] }
  0x41   :  { %602 = vmatprep.subr.mxu0 %v116_v2  ;;  %634 = vmatpush3.msra.mxu1 %v218_v6  ;;  %v111_v12 = vld [vmem:[#allocation5 + $0x40] sm:$0xff]  ;;  %v110_v14 = vld [vmem:[#allocation5 + $0x38] sm:$0xff]  ;;  %v109_v16 = vld [vmem:[#allocation5 + $0x30] sm:$0xff] }
  0x42   :  { %603 = vmatpush3.msra.mxu0 %v116_v2  ;;  %635 = vmatprep.subr.mxu1 %v217_v7  ;;  %v212_v17 = vld [vmem:[#allocation7 + $0x48] sm:$0xff]  ;;  %v211_v19 = vld [vmem:[#allocation7 + $0x40] sm:$0xff]  ;;  %v210_v21 = vld [vmem:[#allocation7 + $0x38] sm:$0xff] }
  0x43   :  { %604 = vmatprep.subr.mxu0 %v115_v3  ;;  %636 = vmatpush3.msra.mxu1 %v217_v7  ;;  %v108_v18 = vld [vmem:[#allocation5 + $0x28] sm:$0xff]  ;;  %v107_v20 = vld [vmem:[#allocation5 + $0x20] sm:$0xff]  ;;  %v106_v22 = vld [vmem:[#allocation5 + $0x18] sm:$0xff] }
  0x44   :  { %605 = vmatpush3.msra.mxu0 %v115_v3  ;;  %637 = vmatprep.subr.mxu1 %v216_v9  ;;  %v209_v23 = vld [vmem:[#allocation7 + $0x30] sm:$0xff]  ;;  %v208_v25 = vld [vmem:[#allocation7 + $0x28] sm:$0xff]  ;;  %v207_v27 = vld [vmem:[#allocation7 + $0x20] sm:$0xff] }
  0x45   :  { %606 = vmatprep.subr.mxu0 %v114_v5  ;;  %638 = vmatpush3.msra.mxu1 %v216_v9  ;;  %v105_v24 = vld [vmem:[#allocation5 + $0x10] sm:$0xff]  ;;  %v104_v26 = vld [vmem:[#allocation5 + $0x8] sm:$0xff]  ;;  %v103_v28 = vld [vmem:[#allocation5] sm:$0xff] }
  0x46   :  { %607 = vmatpush3.msra.mxu0 %v114_v5  ;;  %639 = vmatprep.subr.mxu1 %v215_v11  ;;  %v102_v29 = vld [vmem:[#allocation2 + $0x8] sm:$0xff]  ;;  %v205_v31 = vld [vmem:[#allocation7 + $0x10] sm:$0xff]  ;;  %v204_v32 = vld [vmem:[#allocation7 + $0x8] sm:$0xff] }
  0x47   :  { %608 = vmatprep.subr.mxu0 %v113_v8  ;;  %640 = vmatpush3.msra.mxu1 %v215_v11  ;;  %v206_v30 = vld [vmem:[#allocation7 + $0x18] sm:$0xff]  ;;  %v203_v33 = vld [vmem:[#allocation7] sm:$0xff]  ;;  %v317_v35 = vld [vmem:[#allocation8 + $0x70] sm:$0xff] }
  0x48   :  { %609 = vmatpush3.msra.mxu0 %v113_v8  ;;  %641 = vmatprep.subr.mxu1 %v214_v13  ;;  %v318_v34 = vld [vmem:[#allocation8 + $0x78] sm:$0xff]  ;;  %v316_v36 = vld [vmem:[#allocation8 + $0x68] sm:$0xff]  ;;  %v315_v37 = vld [vmem:[#allocation8 + $0x60] sm:$0xff] }
  0x49   :  { %610 = vmatprep.subr.mxu0 %v112_v10  ;;  %642 = vmatpush3.msra.mxu1 %v214_v13  ;;  %v314_v38 = vld [vmem:[#allocation8 + $0x58] sm:$0xff]  ;;  %v313_v39 = vld [vmem:[#allocation8 + $0x50] sm:$0xff]  ;;  %v312_v40 = vld [vmem:[#allocation8 + $0x48] sm:$0xff] }
  0x4a   :  { %611 = vmatpush3.msra.mxu0 %v112_v10  ;;  %643 = vmatprep.subr.mxu1 %v213_v15  ;;  %v311_v41 = vld [vmem:[#allocation8 + $0x40] sm:$0xff]  ;;  %v310_v42 = vld [vmem:[#allocation8 + $0x38] sm:$0xff]  ;;  %v309_v43 = vld [vmem:[#allocation8 + $0x30] sm:$0xff] }
  0x4b   :  { %612 = vmatprep.subr.mxu0 %v111_v12  ;;  %644 = vmatpush3.msra.mxu1 %v213_v15  ;;  %v308_v44 = vld [vmem:[#allocation8 + $0x28] sm:$0xff]  ;;  %v307_v45 = vld [vmem:[#allocation8 + $0x20] sm:$0xff]  ;;  %v522_v46 = vld [vmem:[%s982_s2] ss:$0 sm:$0xff] }
  0x4c   :  { %613 = vmatpush3.msra.mxu0 %v111_v12  ;;  %645 = vmatprep.subr.mxu1 %v212_v17  ;;  %v306_v53 = vld [vmem:[#allocation8 + $0x18] sm:$0xff]  ;;  %v305_v54 = vld [vmem:[#allocation8 + $0x10] sm:$0xff]  ;;  %v304_v55 = vld [vmem:[#allocation8 + $0x8] sm:$0xff] }
  0x4d   :  { %614 = vmatprep.subr.mxu0 %v110_v14  ;;  %646 = vmatpush3.msra.mxu1 %v212_v17  ;;  %v303_v56 = vld [vmem:[#allocation8] sm:$0xff]  ;;  %v418_v57 = vld [vmem:[#allocation10 + $0x78] sm:$0xff]  ;;  %v417_v58 = vld [vmem:[#allocation10 + $0x70] sm:$0xff] }
  0x4e   :  { %615 = vmatpush3.msra.mxu0 %v110_v14  ;;  %647 = vmatprep.subr.mxu1 %v211_v19  ;;  %v416_v59 = vld [vmem:[#allocation10 + $0x68] sm:$0xff]  ;;  %v415_v60 = vld [vmem:[#allocation10 + $0x60] sm:$0xff]  ;;  %v414_v61 = vld [vmem:[#allocation10 + $0x58] sm:$0xff] }
  0x4f   :  { %616 = vmatprep.subr.mxu0 %v109_v16  ;;  %648 = vmatpush3.msra.mxu1 %v211_v19  ;;  %v413_v62 = vld [vmem:[#allocation10 + $0x50] sm:$0xff]  ;;  %v412_v63 = vld [vmem:[#allocation10 + $0x48] sm:$0xff]  ;;  %v411_v0 = vld [vmem:[#allocation10 + $0x40] sm:$0xff] }
  0x50   :  { %617 = vmatpush3.msra.mxu0 %v109_v16  ;;  %649 = vmatprep.subr.mxu1 %v210_v21  ;;  %v410_v1 = vld [vmem:[#allocation10 + $0x38] sm:$0xff]  ;;  %v409_v2 = vld [vmem:[#allocation10 + $0x30] sm:$0xff]  ;;  %v408_v3 = vld [vmem:[#allocation10 + $0x28] sm:$0xff] }
  0x51   :  { %618 = vmatprep.subr.mxu0 %v108_v18  ;;  %650 = vmatpush3.msra.mxu1 %v210_v21  ;;  %v407_v4 = vld [vmem:[#allocation10 + $0x20] sm:$0xff]  ;;  %v523_v5 = vld [vmem:[%s984_s4] ss:$0 sm:$0xff]  ;;  %v406_v12 = vld [vmem:[#allocation10 + $0x18] sm:$0xff] }
  0x52   :  { %619 = vmatpush3.msra.mxu0 %v108_v18  ;;  %651 = vmatprep.subr.mxu1 %v209_v23  ;;  %v405_v13 = vld [vmem:[#allocation10 + $0x10] sm:$0xff]  ;;  %v404_v14 = vld [vmem:[#allocation10 + $0x8] sm:$0xff]  ;;  %v403_v15 = vld [vmem:[#allocation10] sm:$0xff] }
  0x53   :  { %620 = vmatprep.subr.mxu0 %v107_v20  ;;  %652 = vmatpush3.msra.mxu1 %v209_v23  ;;  %v524_v16 = vld [vmem:[%s986_s6] ss:$0 sm:$0xff]  ;;  %s846_s6 = scalar_lea.vmem %s509_s19, 256 }
  0x54   :  { %621 = vmatpush3.msra.mxu0 %v107_v20  ;;  %653 = vmatprep.subr.mxu1 %v208_v25  ;;  %v525_v23 = vld [vmem:[%s988_s8] ss:$0 sm:$0xff]  ;;  %p847_p11 = scmp.ne.s32.totalorder %s509_s19, %s846_s6  ;;  %p852_p13 = scmp.lt.s32.totalorder %s846_s6, %s846_s6 }
  0x55   :  { %622 = vmatprep.subr.mxu0 %v106_v22  ;;  %654 = vmatpush3.msra.mxu1 %v208_v25 }
  0x56   :  { %623 = vmatpush3.msra.mxu0 %v106_v22  ;;  %655 = vmatprep.subr.mxu1 %v207_v27  ;;  %p853_p0 = por %p852_p13, %p851_p12 }
  0x57   :  { %624 = vmatprep.subr.mxu0 %v105_v24  ;;  %656 = vmatpush3.msra.mxu1 %v207_v27 }
  0x58   :  { %625 = vmatpush3.msra.mxu0 %v105_v24  ;;  %657 = vmatprep.subr.mxu1 %v206_v30  ;;  %p854_p1 = pnand %p853_p0, %p847_p11 }
  0x59   :  { %626 = vmatprep.subr.mxu0 %v104_v26  ;;  %658 = vmatpush3.msra.mxu1 %v206_v30 }
  0x5a   :  { %627 = vmatpush3.msra.mxu0 %v104_v26  ;;  %659 = vmatprep.subr.mxu1 %v205_v31 }
  0x5b   :  { %628 = vmatprep.subr.mxu0 %v103_v28  ;;  %660 = vmatpush3.msra.mxu1 %v205_v31 }
  0x5c   :  { %629 = vmatpush3.msra.mxu0 %v103_v28  ;;  %661 = vmatprep.subr.mxu1 %v204_v32 }
  0x5d   :  { %631 = vmatmul.mubr.f32.vlgmr.msra.gmra.mxu0 %v102_v29  ;;  %662 = vmatpush3.msra.mxu1 %v204_v32 }
  0x5e   :  { %663 = vmatprep.subr.mxu1 %v203_v33  ;;  %668 = vmatprep.subr.mxu0 %v318_v34 }
  0x5f   :  { %664 = vmatpush3.msra.mxu1 %v203_v33  ;;  %669 = vmatpush3.msra.mxu0 %v318_v34 }
  0x60   :  { %670 = vmatprep.subr.mxu0 %v317_v35  ;;  %703 = vmatprep.subr.mxu1 %v418_v57 }
  0x61   :  { %671 = vmatpush3.msra.mxu0 %v317_v35 }
  0x62   :  { %672 = vmatprep.subr.mxu0 %v316_v36 }
  0x63   :  { %673 = vmatpush3.msra.mxu0 %v316_v36 }
  0x64   :  { %674 = vmatprep.subr.mxu0 %v315_v37 }
  0x65   :  { %675 = vmatpush3.msra.mxu0 %v315_v37 }
  0x66   :  { %676 = vmatprep.subr.mxu0 %v314_v38 }
  0x67   :  { %677 = vmatpush3.msra.mxu0 %v314_v38 }
  0x68   :  { %678 = vmatprep.subr.mxu0 %v313_v39 }
  0x69   :  { %679 = vmatpush3.msra.mxu0 %v313_v39 }
  0x6a   :  { %680 = vmatprep.subr.mxu0 %v312_v40 }
  0x6b   :  { %681 = vmatpush3.msra.mxu0 %v312_v40 }
  0x6c   :  { %682 = vmatprep.subr.mxu0 %v311_v41 }
  0x6d   :  { %683 = vmatpush3.msra.mxu0 %v311_v41 }
  0x6e   :  { %684 = vmatprep.subr.mxu0 %v310_v42 }
  0x6f   :  { %685 = vmatpush3.msra.mxu0 %v310_v42 }
  0x70   :  { %686 = vmatprep.subr.mxu0 %v309_v43 }
  0x71   :  { %687 = vmatpush3.msra.mxu0 %v309_v43 }
  0x72   :  { %688 = vmatprep.subr.mxu0 %v308_v44 }
  0x73   :  { %689 = vmatpush3.msra.mxu0 %v308_v44 }
  0x74   :  { %690 = vmatprep.subr.mxu0 %v307_v45 }
  0x75   :  { %691 = vmatpush3.msra.mxu0 %v307_v45 }
  0x76   :  { %692 = vmatprep.subr.mxu0 %v306_v53 }
  0x77   :  { %693 = vmatpush3.msra.mxu0 %v306_v53 }
  0x78   :  { %694 = vmatprep.subr.mxu0 %v305_v54 }
  0x79   :  { %695 = vmatpush3.msra.mxu0 %v305_v54 }
  0x7a   :  { %696 = vmatprep.subr.mxu0 %v304_v55 }
  0x7b   :  { %697 = vmatpush3.msra.mxu0 %v304_v55 }
  0x7c   :  { %698 = vmatprep.subr.mxu0 %v303_v56 }
  0x7d   :  { %699 = vmatpush3.msra.mxu0 %v303_v56 }
 0x11d   :  { %v632_v47 = vpop.f32.mrf.mxu0 }
 0x11e   :  { %v198_v48 = vadd.f32 %v632_v47, %v522_v46 }
 0x11f   :  { %v192_v49 = vpop.f32.mrf.mxu0 }
 0x120   :  { %v193_v50 = vadd.f32 %v522_v46, %v192_v49  ;;  %v202_v52 = vmax.f32 %v198_v48, 0.0 }
 0x122   :  { %v201_v51 = vmax.f32 %v193_v50, 0.0 }
 0x124   :  { %665 = vmatprep.mubr.f32.mxu1 %v201_v51 }
 0x125   :  { %666 = vmatmul.mubr.f32.vlgmr.msra.gmra.mxu1 %v202_v52 }
 0x126   :  { %704 = vmatpush3.msra.mxu1 %v418_v57 }
 0x127   :  { %705 = vmatprep.subr.mxu1 %v417_v58 }
 0x128   :  { %706 = vmatpush3.msra.mxu1 %v417_v58 }
 0x129   :  { %707 = vmatprep.subr.mxu1 %v416_v59 }
 0x12a   :  { %708 = vmatpush3.msra.mxu1 %v416_v59 }
 0x12b   :  { %709 = vmatprep.subr.mxu1 %v415_v60 }
 0x12c   :  { %710 = vmatpush3.msra.mxu1 %v415_v60 }
 0x12d   :  { %711 = vmatprep.subr.mxu1 %v414_v61 }
 0x12e   :  { %712 = vmatpush3.msra.mxu1 %v414_v61 }
 0x12f   :  { %713 = vmatprep.subr.mxu1 %v413_v62 }
 0x130   :  { %714 = vmatpush3.msra.mxu1 %v413_v62 }
 0x131   :  { %715 = vmatprep.subr.mxu1 %v412_v63 }
 0x132   :  { %716 = vmatpush3.msra.mxu1 %v412_v63 }
 0x133   :  { %717 = vmatprep.subr.mxu1 %v411_v0 }
 0x134   :  { %718 = vmatpush3.msra.mxu1 %v411_v0 }
 0x135   :  { %719 = vmatprep.subr.mxu1 %v410_v1 }
 0x136   :  { %720 = vmatpush3.msra.mxu1 %v410_v1 }
 0x137   :  { %721 = vmatprep.subr.mxu1 %v409_v2 }
 0x138   :  { %722 = vmatpush3.msra.mxu1 %v409_v2 }
 0x139   :  { %723 = vmatprep.subr.mxu1 %v408_v3 }
 0x13a   :  { %724 = vmatpush3.msra.mxu1 %v408_v3 }
 0x13b   :  { %725 = vmatprep.subr.mxu1 %v407_v4 }
 0x13c   :  { %726 = vmatpush3.msra.mxu1 %v407_v4 }
 0x13d   :  { %727 = vmatprep.subr.mxu1 %v406_v12 }
 0x13e   :  { %728 = vmatpush3.msra.mxu1 %v406_v12 }
 0x13f   :  { %729 = vmatprep.subr.mxu1 %v405_v13 }
 0x140   :  { %730 = vmatpush3.msra.mxu1 %v405_v13 }
 0x141   :  { %731 = vmatprep.subr.mxu1 %v404_v14 }
 0x142   :  { %732 = vmatpush3.msra.mxu1 %v404_v14 }
 0x143   :  { %733 = vmatprep.subr.mxu1 %v403_v15 }
 0x144   :  { %734 = vmatpush3.msra.mxu1 %v403_v15 }
 0x1e5   :  { %v667_v6 = vpop.f32.mrf.mxu1 }
 0x1e6   :  { %v298_v7 = vadd.f32 %v667_v6, %v523_v5 }
 0x1e7   :  { %v292_v8 = vpop.f32.mrf.mxu1 }
 0x1e8   :  { %v293_v9 = vadd.f32 %v523_v5, %v292_v8  ;;  %v302_v11 = vmax.f32 %v298_v7, 0.0 }
 0x1ea   :  { %v301_v10 = vmax.f32 %v293_v9, 0.0 }
 0x1ec   :  { %700 = vmatprep.mubr.f32.mxu0 %v301_v10 }
 0x1ed   :  { %701 = vmatmul.mubr.f32.vlgmr.msra.gmra.mxu0 %v302_v11 }
 0x2ad   :  { %v702_v17 = vpop.f32.mrf.mxu0 }
 0x2ae   :  { %v398_v18 = vadd.f32 %v702_v17, %v524_v16 }
 0x2af   :  { %v392_v19 = vpop.f32.mrf.mxu0 }
 0x2b0   :  { %v393_v20 = vadd.f32 %v524_v16, %v392_v19  ;;  %v402_v22 = vmax.f32 %v398_v18, 0.0 }
 0x2b2   :  { %v401_v21 = vmax.f32 %v393_v20, 0.0 }
 0x2b4   :  { %735 = vmatprep.mubr.f32.mxu1 %v401_v21 }
 0x2b5   :  { %736 = vmatmul.mubr.f32.vlgmr.msra.gmra.mxu1 %v402_v22 }
 0x375   :  { %v737_v24 = vpop.f32.mrf.mxu1 }
 0x376   :  { %v498_v25 = vadd.f32 %v737_v24, %v525_v23 }
 0x377   :  { %v492_v26 = vpop.f32.mrf.mxu1 }
 0x378   :  { %502 = vst [vmem:[#allocation11 + $0x8] sm:$0xff] %v498_v25  ;;  %v493_v27 = vadd.f32 %v525_v23, %v492_v26 }
 0x37a   :  { %501 = vst [vmem:[#allocation11] sm:$0xff] %v493_v27 }
 0x37b   :  { %857 = shalt.err (!%p854_p1)
}
 0x37c   :  { %514 = dma.vmem_to_hbm [thread:$0]  %s509_s19, 256, %s989_s9, [#allocation4], %s876_s14, %s876_s14, %s877_s15  }
 0x37d   :  { %872 = dma.done.wait [#allocation4], 256  }
 0x37e   :  { %873 = vsyncadd [#allocation4], 4294967040 }
 0x37f   :  { %518 = vsyncpa [#allocation3], 1 }
 0x380   :  { %519 = vsyncpa [#allocation6], 1 }
 0x381   :  { %520 = vsyncpa [#allocation9], 1 }
 0x382   :  { %521 = vsyncpa [#allocation4], 1 }

</bundles_post_ra>
